<compile_context>
chip_gen: v7x
topology: tpu7x:2x2x1
jax: 0.10.0
libtpu: 0.0.40
codegen_flags: <defaults>
</compile_context>

<pallas_src>
import math
import functools

import jax
import jax.numpy as jnp
from jax import lax
from jax.experimental import pallas as pl
from jax.experimental.pallas import tpu as pltpu

# Hard-concrete stretch limits (standard L0-regularization constants).
LIMIT_A = -0.1
LIMIT_B = 1.1
TEMPERATURE = 2.0 / 3.0
_INV_TEMPERATURE = 1.0 / TEMPERATURE
_SCALE = LIMIT_B - LIMIT_A


def _gated_linear_kernel(x_ref, w_ref, wla_ref, b_ref, bla_ref, o_ref, acc_ref):
    """Tiled kernel: gate evaluation + gated matmul accumulate; bias on last K step."""
    k = pl.program_id(2)

    @pl.when(k == 0)
    def _():
        acc_ref[...] = jnp.zeros_like(acc_ref)

    # Hard-concrete gate medians for this (tn, tk) weight tile (f32 gate math).
    wz = jnp.clip(
        jax.nn.sigmoid(wla_ref[...] * _INV_TEMPERATURE) * _SCALE + LIMIT_A, 0.0, 1.0
    )
    gated_w = wz * w_ref[...]                                   # (tn, tk)

    # x @ gated_w.T without an XLU transpose: contract the last dims of both tiles.
    acc_ref[...] += lax.dot_general(
        x_ref[...], gated_w,
        dimension_numbers=(((1,), (1,)), ((), ())),
        preferred_element_type=jnp.float32,
    )

    @pl.when(k == pl.num_programs(2) - 1)
    def _():
        # Bias gate is tiny (1, tn); evaluate it only in the finalize branch.
        bz = jnp.clip(
            jax.nn.sigmoid(bla_ref[...] * _INV_TEMPERATURE) * _SCALE + LIMIT_A, 0.0, 1.0
        )
        o_ref[...] = (acc_ref[...] + bz * b_ref[...]).astype(o_ref.dtype)


def _round_up(v, m):
    return (v + m - 1) // m * m


@jax.jit
def gated_linear_forward(x, weight, weight_log_alpha, bias, bias_log_alpha):
    B, in_f = x.shape
    out_f, _ = weight.shape

    # Tile sizes: lane dims multiples of 128, M dim multiple of 8; sized so the
    # double-buffered f32 working set (2*(x + w + wla) tiles + out + acc) stays
    # comfortably inside v7x's 32 MiB scoped / 64 MiB physical VMEM budget.
    tm = min(128, _round_up(B, 8))
    tn = min(256, _round_up(out_f, 128))
    tk = min(256, _round_up(in_f, 128))

    Bp = _round_up(B, tm)
    Np = _round_up(out_f, tn)
    Kp = _round_up(in_f, tk)

    # Zero-pad to whole tiles. Padded weight entries are zero, so regardless of the
    # (0.5) gate value on padded log_alpha, gated_w is zero there; padded x columns
    # are zero; padded bias is zero -> padded output columns are exactly zero and
    # are sliced away below.
    xp = jnp.pad(x, ((0, Bp - B), (0, Kp - in_f)))
    wp = jnp.pad(weight, ((0, Np - out_f), (0, Kp - in_f)))
    wlap = jnp.pad(weight_log_alpha, ((0, Np - out_f), (0, Kp - in_f)))
    bp = jnp.pad(bias.reshape(1, out_f), ((0, 0), (0, Np - out_f)))
    blap = jnp.pad(bias_log_alpha.reshape(1, out_f), ((0, 0), (0, Np - out_f)))

    grid = (Bp // tm, Np // tn, Kp // tk)

    out_p = pl.pallas_call(
        _gated_linear_kernel,
        out_shape=jax.ShapeDtypeStruct((Bp, Np), x.dtype),
        grid_spec=pltpu.PrefetchScalarGridSpec(
            num_scalar_prefetch=0,
            grid=grid,
            in_specs=[
                pl.BlockSpec((tm, tk), lambda i, j, k: (i, k)),   # x
                pl.BlockSpec((tn, tk), lambda i, j, k: (j, k)),   # weight
                pl.BlockSpec((tn, tk), lambda i, j, k: (j, k)),   # weight_log_alpha
                pl.BlockSpec((1, tn), lambda i, j, k: (0, j)),    # bias row
                pl.BlockSpec((1, tn), lambda i, j, k: (0, j)),    # bias_log_alpha row
            ],
            out_specs=pl.BlockSpec((tm, tn), lambda i, j, k: (i, j)),
            scratch_shapes=[pltpu.VMEM((tm, tn), jnp.float32)],
        ),
        compiler_params=pltpu.CompilerParams(
            dimension_semantics=("parallel", "parallel", "arbitrary"),
        ),
    )(xp, wp, wlap, bp, blap)

    return out_p[:B, :out_f]


def reference_forward(x, weight, weight_log_alpha, bias, bias_log_alpha):
    wz = jnp.clip(
        jax.nn.sigmoid(weight_log_alpha / TEMPERATURE) * _SCALE + LIMIT_A, 0.0, 1.0
    )
    bz = jnp.clip(
        jax.nn.sigmoid(bias_log_alpha / TEMPERATURE) * _SCALE + LIMIT_A, 0.0, 1.0
    )
    return x @ (wz * weight).T + bz * bias


if __name__ == "__main__":
    # Small shapes consistent with the module.
    batch, in_features, out_features = 2, 32, 16
    droprate_init = 0.5

    key = jax.random.PRNGKey(0)
    k_x, k_w, k_b, k_wla, k_bla = jax.random.split(key, 5)

    # Deterministic parameter init mirroring GatedLinear.init_parameters:
    #   kaiming_normal_(weight, mode='fan_out') -> std = sqrt(2 / out_features)
    #   bias ~ N(0, 0.01)
    #   {weight,bias}_log_alpha ~ N(log((1-d)/d), 0.1)
    weight = jax.random.normal(k_w, (out_features, in_features), jnp.float32) * math.sqrt(
        2.0 / out_features
    )
    bias = jax.random.normal(k_b, (out_features,), jnp.float32) * 0.01
    gate_mean_init = math.log((1.0 - droprate_init) / droprate_init)
    weight_log_alpha = gate_mean_init + 0.1 * jax.random.normal(
        k_wla, (out_features, in_features), jnp.float32
    )
    bias_log_alpha = gate_mean_init + 0.1 * jax.random.normal(
        k_bla, (out_features,), jnp.float32
    )

    x = jax.random.normal(k_x, (batch, in_features), jnp.float32)

    out = gated_linear_forward(x, weight, weight_log_alpha, bias, bias_log_alpha)
    out = jax.block_until_ready(out)

    ref = reference_forward(x, weight, weight_log_alpha, bias, bias_log_alpha)
    assert out.shape == (batch, out_features)
    assert jnp.allclose(out, ref, atol=1e-5, rtol=1e-5), "Pallas output mismatch vs reference"

    print("KERNEL_OK")
</pallas_src>

<mosaic_0001>
module attributes {stable_mosaic.version = 11 : i64} {
  func.func @_gated_linear_kernel(%arg0: i32, %arg1: i32, %arg2: i32, %arg3: memref<8x128xf32, #tpu.memory_space<vmem>>, %arg4: memref<128x128xf32, #tpu.memory_space<vmem>>, %arg5: memref<128x128xf32, #tpu.memory_space<vmem>>, %arg6: memref<1x128xf32, #tpu.memory_space<vmem>>, %arg7: memref<1x128xf32, #tpu.memory_space<vmem>>, %arg8: memref<8x128xf32, #tpu.memory_space<vmem>>, %arg9: memref<8x128xf32, #tpu.memory_space<vmem>>) attributes {dimension_semantics = [#tpu.dimension_semantics<parallel>, #tpu.dimension_semantics<parallel>, #tpu.dimension_semantics<arbitrary>], iteration_bounds = array<i64: 1, 1, 1>, scalar_prefetch = 0 : i64, scratch_operands = 1 : i64, tpu.core_type = #tpu.core_type<tc>, window_params = [{transform_indices = @transform_0, window_bounds = array<i64: 8, 128>}, {transform_indices = @transform_1, window_bounds = array<i64: 128, 128>}, {transform_indices = @transform_2, window_bounds = array<i64: 128, 128>}, {transform_indices = @transform_3, window_bounds = array<i64: 1, 128>}, {transform_indices = @transform_4, window_bounds = array<i64: 1, 128>}, {transform_indices = @transform_5, window_bounds = array<i64: 8, 128>}]} {
    %c0_i32 = arith.constant 0 : i32
    %0 = arith.cmpi eq, %arg2, %c0_i32 : i32
    %1 = arith.extui %0 : i1 to i32
    %c0_i32_0 = arith.constant 0 : i32
    %2 = arith.cmpi ne, %1, %c0_i32_0 : i32
    scf.if %2 {
      %cst_18 = arith.constant 0.000000e+00 : f32
      %29 = vector.broadcast %cst_18 : f32 to vector<8x128xf32>
      %c0_19 = arith.constant 0 : index
      %c0_20 = arith.constant 0 : index
      %30 = vector.load %arg9[%c0_19, %c0_20] : memref<8x128xf32, #tpu.memory_space<vmem>>, vector<8x128xf32>
      tpu.vector_store %arg9[%c0_19, %c0_20], %29 {strides = array<i32>} : memref<8x128xf32, #tpu.memory_space<vmem>>, vector<8x128xf32>,
    } else {
    }
    %c0 = arith.constant 0 : index
    %c0_1 = arith.constant 0 : index
    %3 = vector.load %arg5[%c0, %c0_1] : memref<128x128xf32, #tpu.memory_space<vmem>>, vector<128x128xf32>
    %cst = arith.constant 1.500000e+00 : f32
    %4 = vector.broadcast %cst : f32 to vector<128x128xf32>
    %5 = arith.mulf %3, %4 : vector<128x128xf32>
    %6 = arith.negf %5 : vector<128x128xf32>
    %7 = math.exp %6 : vector<128x128xf32>
    %cst_2 = arith.constant 1.000000e+00 : f32
    %8 = vector.broadcast %cst_2 : f32 to vector<128x128xf32>
    %9 = arith.addf %8, %7 : vector<128x128xf32>
    %10 = arith.divf %8, %9 : vector<128x128xf32>
    %cst_3 = arith.constant 1.200000e+00 : f32
    %11 = vector.broadcast %cst_3 : f32 to vector<128x128xf32>
    %12 = arith.mulf %10, %11 : vector<128x128xf32>
    %cst_4 = arith.constant -1.000000e-01 : f32
    %13 = vector.broadcast %cst_4 : f32 to vector<128x128xf32>
    %14 = arith.addf %12, %13 : vector<128x128xf32>
    %cst_5 = arith.constant 0.000000e+00 : f32
    %cst_6 = arith.constant 1.000000e+00 : f32
    %15 = vector.broadcast %cst_5 : f32 to vector<128x128xf32>
    %16 = arith.maximumf %15, %14 : vector<128x128xf32>
    %17 = vector.broadcast %cst_6 : f32 to vector<128x128xf32>
    %18 = arith.minimumf %17, %16 : vector<128x128xf32>
    %c0_7 = arith.constant 0 : index
    %c0_8 = arith.constant 0 : index
    %19 = vector.load %arg4[%c0_7, %c0_8] : memref<128x128xf32, #tpu.memory_space<vmem>>, vector<128x128xf32>
    %20 = arith.mulf %18, %19 : vector<128x128xf32>
    %c0_9 = arith.constant 0 : index
    %c0_10 = arith.constant 0 : index
    %21 = vector.load %arg9[%c0_9, %c0_10] : memref<8x128xf32, #tpu.memory_space<vmem>>, vector<8x128xf32>
    %c0_11 = arith.constant 0 : index
    %c0_12 = arith.constant 0 : index
    %22 = vector.load %arg3[%c0_11, %c0_12] : memref<8x128xf32, #tpu.memory_space<vmem>>, vector<8x128xf32>
    %cst_13 = arith.constant dense<0.000000e+00> : vector<8x128xf32>
    %23 = tpu.matmul %22, %20, %cst_13 {dimension_numbers = #tpu.dot_dimension_numbers<[1], [1], [0], [0], [0, 0, 1, 0], [], []>} : vector<8x128xf32>, vector<128x128xf32>, vector<8x128xf32> -> vector<8x128xf32>
    %24 = arith.addf %21, %23 : vector<8x128xf32>
    %c0_14 = arith.constant 0 : index
    %c0_15 = arith.constant 0 : index
    %25 = vector.load %arg9[%c0_14, %c0_15] : memref<8x128xf32, #tpu.memory_space<vmem>>, vector<8x128xf32>
    tpu.vector_store %arg9[%c0_14, %c0_15], %24 {strides = array<i32>} : memref<8x128xf32, #tpu.memory_space<vmem>>, vector<8x128xf32>,
    %c0_i32_16 = arith.constant 0 : i32
    %26 = arith.cmpi eq, %arg2, %c0_i32_16 : i32
    %27 = arith.extui %26 : i1 to i32
    %c0_i32_17 = arith.constant 0 : i32
    %28 = arith.cmpi ne, %27, %c0_i32_17 : i32
    scf.if %28 {
      %c0_18 = arith.constant 0 : index
      %c0_19 = arith.constant 0 : index
      %29 = vector.load %arg7[%c0_18, %c0_19] : memref<1x128xf32, #tpu.memory_space<vmem>>, vector<1x128xf32>
      %cst_20 = arith.constant 1.500000e+00 : f32
      %30 = vector.broadcast %cst_20 : f32 to vector<1x128xf32>
      %31 = arith.mulf %29, %30 : vector<1x128xf32>
      %32 = arith.negf %31 : vector<1x128xf32>
      %33 = math.exp %32 : vector<1x128xf32>
      %cst_21 = arith.constant 1.000000e+00 : f32
      %34 = vector.broadcast %cst_21 : f32 to vector<1x128xf32>
      %35 = arith.addf %34, %33 : vector<1x128xf32>
      %36 = arith.divf %34, %35 : vector<1x128xf32>
      %cst_22 = arith.constant 1.200000e+00 : f32
      %37 = vector.broadcast %cst_22 : f32 to vector<1x128xf32>
      %38 = arith.mulf %36, %37 : vector<1x128xf32>
      %cst_23 = arith.constant -1.000000e-01 : f32
      %39 = vector.broadcast %cst_23 : f32 to vector<1x128xf32>
      %40 = arith.addf %38, %39 : vector<1x128xf32>
      %cst_24 = arith.constant 0.000000e+00 : f32
      %cst_25 = arith.constant 1.000000e+00 : f32
      %41 = vector.broadcast %cst_24 : f32 to vector<1x128xf32>
      %42 = arith.maximumf %41, %40 : vector<1x128xf32>
      %43 = vector.broadcast %cst_25 : f32 to vector<1x128xf32>
      %44 = arith.minimumf %43, %42 : vector<1x128xf32>
      %c0_26 = arith.constant 0 : index
      %c0_27 = arith.constant 0 : index
      %45 = vector.load %arg9[%c0_26, %c0_27] : memref<8x128xf32, #tpu.memory_space<vmem>>, vector<8x128xf32>
      %c0_28 = arith.constant 0 : index
      %c0_29 = arith.constant 0 : index
      %46 = vector.load %arg6[%c0_28, %c0_29] : memref<1x128xf32, #tpu.memory_space<vmem>>, vector<1x128xf32>
      %47 = arith.mulf %44, %46 : vector<1x128xf32>
      %48 = vector.broadcast %47 : vector<1x128xf32> to vector<8x128xf32>
      %49 = arith.addf %45, %48 : vector<8x128xf32>
      %c0_30 = arith.constant 0 : index
      %c0_31 = arith.constant 0 : index
      %50 = vector.load %arg8[%c0_30, %c0_31] : memref<8x128xf32, #tpu.memory_space<vmem>>, vector<8x128xf32>
      tpu.vector_store %arg8[%c0_30, %c0_31], %49 {strides = array<i32>} : memref<8x128xf32, #tpu.memory_space<vmem>>, vector<8x128xf32>,
    } else {
    }
    return
  }
  func.func @transform_0(%arg0: i32, %arg1: i32, %arg2: i32) -> (i32, i32) {
    %c0_i32 = arith.constant 0 : i32
    return %arg0, %arg2 : i32, i32
  }
  func.func @transform_1(%arg0: i32, %arg1: i32, %arg2: i32) -> (i32, i32) {
    %c0_i32 = arith.constant 0 : i32
    return %arg1, %arg2 : i32, i32
  }
  func.func @transform_2(%arg0: i32, %arg1: i32, %arg2: i32) -> (i32, i32) {
    %c0_i32 = arith.constant 0 : i32
    return %arg1, %arg2 : i32, i32
  }
  func.func @transform_3(%arg0: i32, %arg1: i32, %arg2: i32) -> (i32, i32) {
    %c0_i32 = arith.constant 0 : i32
    %c0_i32_0 = arith.constant 0 : i32
    return %c0_i32, %arg1 : i32, i32
  }
  func.func @transform_4(%arg0: i32, %arg1: i32, %arg2: i32) -> (i32, i32) {
    %c0_i32 = arith.constant 0 : i32
    %c0_i32_0 = arith.constant 0 : i32
    return %c0_i32, %arg1 : i32, i32
  }
  func.func @transform_5(%arg0: i32, %arg1: i32, %arg2: i32) -> (i32, i32) {
    %c0_i32 = arith.constant 0 : i32
    return %arg0, %arg1 : i32, i32
  }
}

</mosaic_0001>

<bundles_post_ra>
// kernel: gated_linear_forward.1
= control target key start
LH: loop header
LB: loop body
LE: loop exit
PB: predicated region body
PF: predicated region fallthrough
CT: control target
= control target key end

     0   :  { %v517_v0 = vmov 0.0|0.0   ;;  %vm518_vm0 = vmmov 0   ;;  %v519_v3 = vmov 0.0   ;;  %s666_s2 = inlined_call_operand.vmem [shape: f32[128,128], index: 2, kind: input, shape index: {}]   ;;  %s667_s1 = inlined_call_operand.vmem [shape: f32[128,128], index: 1, kind: input, shape index: {}]   ;;  %s668_s0 = inlined_call_operand.vmem [shape: f32[8,128], index: 0, kind: input, shape index: {}]   ;;  %s669_s4 = inlined_call_operand.vmem [shape: f32[1,128], index: 4, kind: input, shape index: {}]   ;;  %s670_s3 = inlined_call_operand.vmem [shape: f32[1,128], index: 3, kind: input, shape index: {}]   ;;  %s671_s5 = inlined_call_operand.vmem [shape: f32[8,128], index: 5, kind: output, shape index: {}]  }
   0x1   :  { %422 = vmatprep.subr.bf16.mxu0 %v517_v0  ;;  %v25_v1 = vld [vmem:[%s666_s2] sm:$0xff]  ;;  %v26_v2 = vld [vmem:[%s666_s2 + $0x8] sm:$0xff]  ;;  %419 = vmatprep.mubr.msk.f32.mxu0 %vm518_vm0, %v519_v3  ;;  %v27_v6 = vld [vmem:[%s666_s2 + $0x10] sm:$0xff] }
   0x2   :  { %v353_v4 = vmul.f32 -1.5, %v25_v1  ;;  %v354_v5 = vmul.f32 -1.5, %v26_v2  ;;  %v28_v7 = vld [vmem:[%s666_s2 + $0x18] sm:$0xff]  ;;  %v355_v8 = vmul.f32 -1.5, %v27_v6  ;;  %v29_v10 = vld [vmem:[%s666_s2 + $0x20] sm:$0xff]  ;;  %v30_v13 = vld [vmem:[%s666_s2 + $0x28] sm:$0xff] }
   0x3   :  { %v356_v9 = vmul.f32 -1.5, %v28_v7  ;;  %v357_v14 = vmul.f32 -1.5, %v29_v10  ;;  %v358_v17 = vmul.f32 -1.5, %v30_v13  ;;  %v31_v19 = vld [vmem:[%s666_s2 + $0x30] sm:$0xff]  ;;  %v32_v20 = vld [vmem:[%s666_s2 + $0x38] sm:$0xff]  ;;  %v33_v24 = vld [vmem:[%s666_s2 + $0x40] sm:$0xff] }
   0x4   :  { %v73_v11 = vmul.f32 1.442695, %v353_v4  ;;  %v75_v12 = vmul.f32 1.442695, %v354_v5  ;;  %v77_v15 = vmul.f32 1.442695, %v355_v8 }
   0x5   :  { %v79_v16 = vmul.f32 1.442695, %v356_v9  ;;  %v81_v18 = vmul.f32 1.442695, %v357_v14  ;;  %v83_v21 = vmul.f32 1.442695, %v358_v17 }
   0x6   :  { %449 = vpow2.f32 %v73_v11  ;;  %v359_v22 = vmul.f32 -1.5, %v31_v19  ;;  %v360_v23 = vmul.f32 -1.5, %v32_v20  ;;  %v34_v25 = vld [vmem:[%s666_s2 + $0x48] sm:$0xff]  ;;  %v361_v28 = vmul.f32 -1.5, %v33_v24  ;;  %v35_v32 = vld [vmem:[%s666_s2 + $0x50] sm:$0xff]  ;;  %v36_v34 = vld [vmem:[%s666_s2 + $0x58] sm:$0xff] }
   0x7   :  { %451 = vpow2.f32 %v75_v12  ;;  %v362_v29 = vmul.f32 -1.5, %v34_v25  ;;  %v363_v37 = vmul.f32 -1.5, %v35_v32  ;;  %v364_v42 = vmul.f32 -1.5, %v36_v34  ;;  %v37_v53 = vld [vmem:[%s666_s2 + $0x60] sm:$0xff]  ;;  %v38_v55 = vld [vmem:[%s666_s2 + $0x68] sm:$0xff]  ;;  %v39_v3 = vld [vmem:[%s666_s2 + $0x70] sm:$0xff] }
   0x8   :  { %453 = vpow2.f32 %v77_v15  ;;  %v85_v26 = vmul.f32 1.442695, %v359_v22  ;;  %v87_v27 = vmul.f32 1.442695, %v360_v23  ;;  %v89_v30 = vmul.f32 1.442695, %v361_v28 }
   0x9   :  { %455 = vpow2.f32 %v79_v16  ;;  %v91_v31 = vmul.f32 1.442695, %v362_v29  ;;  %v93_v47 = vmul.f32 1.442695, %v363_v37  ;;  %v95_v51 = vmul.f32 1.442695, %v364_v42 }
   0xa   :  { %457 = vpow2.f32 %v81_v18  ;;  %v365_v57 = vmul.f32 -1.5, %v37_v53  ;;  %v366_v60 = vmul.f32 -1.5, %v38_v55  ;;  %v40_v8 = vld [vmem:[%s666_s2 + $0x78] sm:$0xff]  ;;  %v217_v20 = vld [vmem:[%s667_s1] sm:$0xff]  ;;  %v218_v24 = vld [vmem:[%s667_s1 + $0x8] sm:$0xff] }
   0xb   :  { %459 = vpow2.f32 %v83_v21 }
   0xc   :  { %461 = vpow2.f32 %v85_v26  ;;  %v97_v2 = vmul.f32 1.442695, %v365_v57  ;;  %v99_v12 = vmul.f32 1.442695, %v366_v60  ;;  %v367_v26 = vmul.f32 -1.5, %v39_v3 }
   0xd   :  { %463 = vpow2.f32 %v87_v27 }
   0xe   :  { %465 = vpow2.f32 %v89_v30  ;;  %v368_v30 = vmul.f32 -1.5, %v40_v8  ;;  %v101_v42 = vmul.f32 1.442695, %v367_v26 }
   0xf   :  { %467 = vpow2.f32 %v91_v31 }
  0x10   :  { %v450_v33 = vpop.eup %449 }
  0x11   :  { %v452_v35 = vpop.eup %451  ;;  %v105_v36 = vadd.f32 1.0, %v450_v33 }
  0x12   :  { %v454_v38 = vpop.eup %453  ;;  %v106_v39 = vadd.f32 1.0, %v452_v35 }
  0x13   :  { %v456_v40 = vpop.eup %455  ;;  %469 = vrcp.f32 %v105_v36  ;;  %v107_v41 = vadd.f32 1.0, %v454_v38 }
  0x14   :  { %v458_v43 = vpop.eup %457  ;;  %471 = vrcp.f32 %v106_v39  ;;  %v108_v44 = vadd.f32 1.0, %v456_v40  ;;  %v219_v40 = vld [vmem:[%s667_s1 + $0x10] sm:$0xff] }
  0x15   :  { %v460_v45 = vpop.eup %459  ;;  %473 = vrcp.f32 %v107_v41  ;;  %v109_v46 = vadd.f32 1.0, %v458_v43  ;;  %v220_v41 = vld [vmem:[%s667_s1 + $0x18] sm:$0xff] }
  0x16   :  { %v462_v48 = vpop.eup %461  ;;  %475 = vrcp.f32 %v108_v44  ;;  %v110_v49 = vadd.f32 1.0, %v460_v45  ;;  %v103_v44 = vmul.f32 1.442695, %v368_v30 }
  0x17   :  { %v464_v50 = vpop.eup %463  ;;  %477 = vrcp.f32 %v109_v46  ;;  %v111_v52 = vadd.f32 1.0, %v462_v48 }
  0x18   :  { %479 = vrcp.f32 %v110_v49  ;;  %v112_v54 = vadd.f32 1.0, %v464_v50  ;;  %v466_v56 = vpop.eup %465 }
  0x19   :  { %481 = vpow2.f32 %v93_v47  ;;  %v468_v58 = vpop.eup %467  ;;  %v113_v7 = vadd.f32 1.0, %v466_v56 }
  0x1a   :  { %483 = vpow2.f32 %v95_v51  ;;  %v114_v17 = vadd.f32 1.0, %v468_v58 }
  0x1b   :  { %485 = vrcp.f32 %v111_v52 }
  0x1c   :  { %487 = vrcp.f32 %v112_v54 }
  0x1d   :  { %v470_v59 = vpop.eup %469  ;;  %489 = vpow2.f32 %v97_v2 }
  0x1e   :  { %v472_v61 = vpop.eup %471  ;;  %v153_v62 = vmul.f32 1.2, %v470_v59  ;;  %491 = vrcp.f32 %v113_v7 }
  0x1f   :  { %v474_v63 = vpop.eup %473  ;;  %v154_v1 = vmul.f32 1.2, %v472_v61  ;;  %493 = vpow2.f32 %v99_v12  ;;  %v221_v61 = vld [vmem:[%s667_s1 + $0x20] sm:$0xff] }
  0x20   :  { %v476_v4 = vpop.eup %475  ;;  %v169_v5 = vadd.f32 -0.1, %v153_v62  ;;  %v155_v6 = vmul.f32 1.2, %v474_v63  ;;  %495 = vrcp.f32 %v114_v17  ;;  %v222_v62 = vld [vmem:[%s667_s1 + $0x28] sm:$0xff] }
  0x21   :  { %v478_v9 = vpop.eup %477  ;;  %v170_v10 = vadd.f32 -0.1, %v154_v1  ;;  %v156_v11 = vmul.f32 1.2, %v476_v4 }
  0x22   :  { %v480_v13 = vpop.eup %479  ;;  %v185_v14 = vmax.f32 %v169_v5, 0.0  ;;  %v171_v15 = vadd.f32 -0.1, %v155_v6  ;;  %v157_v16 = vmul.f32 1.2, %v478_v9 }
  0x23   :  { %v482_v18 = vpop.eup %481  ;;  %v186_v19 = vmax.f32 %v170_v10, 0.0  ;;  %v172_v21 = vadd.f32 -0.1, %v156_v11  ;;  %v158_v22 = vmul.f32 1.2, %v480_v13 }
  0x24   :  { %v201_v23 = vmin.f32 %v185_v14, 1.0  ;;  %v187_v25 = vmax.f32 %v171_v15, 0.0  ;;  %v484_v27 = vpop.eup %483  ;;  %v173_v33 = vadd.f32 -0.1, %v157_v16  ;;  %v115_v34 = vadd.f32 1.0, %v482_v18  ;;  %v223_v14 = vld [vmem:[%s667_s1 + $0x30] sm:$0xff] }
  0x25   :  { %v202_v28 = vmin.f32 %v186_v19, 1.0  ;;  %v188_v29 = vmax.f32 %v172_v21, 0.0  ;;  %v486_v31 = vpop.eup %485  ;;  %v174_v39 = vadd.f32 -0.1, %v158_v22  ;;  %v116_v47 = vadd.f32 1.0, %v484_v27  ;;  %v224_v18 = vld [vmem:[%s667_s1 + $0x38] sm:$0xff] }
  0x26   :  { %v233_v32 = vmul.f32 %v217_v20, %v201_v23  ;;  %v488_v35 = vpop.eup %487  ;;  %v203_v37 = vmin.f32 %v187_v25, 1.0  ;;  %v159_v45 = vmul.f32 1.2, %v486_v31  ;;  %497 = vrcp.f32 %v115_v34  ;;  %v225_v34 = vld [vmem:[%s667_s1 + $0x40] sm:$0xff] }
  0x27   :  { %v234_v36 = vmul.f32 %v218_v24, %v202_v28  ;;  %v204_v38 = vmin.f32 %v188_v29, 1.0  ;;  %v160_v46 = vmul.f32 1.2, %v488_v35  ;;  %v189_v50 = vmax.f32 %v173_v33, 0.0  ;;  %v490_v52 = vpop.eup %489  ;;  %v226_v35 = vld [vmem:[%s667_s1 + $0x48] sm:$0xff] }
  0x28   :  { %v235_v48 = vmul.f32 %v219_v40, %v203_v37  ;;  %v190_v51 = vmax.f32 %v174_v39, 0.0  ;;  %499 = vpow2.f32 %v101_v42  ;;  %v492_v53 = vpop.eup %491  ;;  %v175_v54 = vadd.f32 -0.1, %v159_v45 }
  0x29   :  { %v423_v43 = vpack.c.bf16 %v234_v36, %v233_v32  ;;  %v236_v49 = vmul.f32 %v220_v41, %v204_v38  ;;  %501 = vpow2.f32 %v103_v44  ;;  %v494_v55 = vpop.eup %493  ;;  %v205_v57 = vmin.f32 %v189_v50, 1.0  ;;  %v228_v50 = vld [vmem:[%s667_s1 + $0x58] sm:$0xff] }
  0x2a   :  { %503 = vrcp.f32 %v116_v47  ;;  %v206_v58 = vmin.f32 %v190_v51, 1.0  ;;  %v176_v59 = vadd.f32 -0.1, %v160_v46  ;;  %v496_v60 = vpop.eup %495  ;;  %v117_v63 = vadd.f32 1.0, %v490_v52  ;;  %v227_v47 = vld [vmem:[%s667_s1 + $0x50] sm:$0xff] }
  0x2b   :  { %424 = vmatpush3.bf16.xpose.msra.mxu0 %v423_v43  ;;  %v426_v56 = vpack.c.bf16 %v236_v49, %v235_v48  ;;  %v191_v1 = vmax.f32 %v175_v54, 0.0  ;;  %v161_v2 = vmul.f32 1.2, %v492_v53  ;;  %v118_v3 = vadd.f32 1.0, %v494_v55 }
  0x2c   :  { %425 = vmatprep.subr.bf16.mxu0 %v517_v0  ;;  %v237_v4 = vmul.f32 %v221_v61, %v205_v57  ;;  %v238_v5 = vmul.f32 %v222_v62, %v206_v58  ;;  %v192_v6 = vmax.f32 %v176_v59, 0.0  ;;  %v162_v7 = vmul.f32 1.2, %v496_v60  ;;  %v229_v62 = vld [vmem:[%s667_s1 + $0x60] sm:$0xff] }
  0x2d   :  { %505 = vrcp.f32 %v117_v63  ;;  %v207_v10 = vmin.f32 %v191_v1, 1.0  ;;  %v177_v15 = vadd.f32 -0.1, %v161_v2  ;;  %v230_v63 = vld [vmem:[%s667_s1 + $0x68] sm:$0xff] }
  0x2e   :  { %507 = vrcp.f32 %v118_v3  ;;  %v429_v12 = vpack.c.bf16 %v238_v5, %v237_v4  ;;  %v208_v13 = vmin.f32 %v192_v6, 1.0  ;;  %v178_v16 = vadd.f32 -0.1, %v162_v7 }
  0x2f   :  { %v239_v20 = vmul.f32 %v223_v14, %v207_v10  ;;  %v193_v24 = vmax.f32 %v177_v15, 0.0  ;;  %v326_v14 = vld [vmem:[%s669_s4] sm:$0x1] }
  0x30   :  { %v498_v8 = vpop.eup %497  ;;  %v240_v23 = vmul.f32 %v224_v18, %v208_v13  ;;  %v194_v25 = vmax.f32 %v178_v16, 0.0  ;;  %v250_v13 = vld [vmem:[%s668_s0] sm:$0xff]  ;;  %v369_v15 = vmul.f32 -1.5, %v326_v14 }
  0x31   :  { %v163_v21 = vmul.f32 1.2, %v498_v8  ;;  %v209_v30 = vmin.f32 %v193_v24, 1.0  ;;  %v231_v8 = vld [vmem:[%s667_s1 + $0x70] sm:$0xff] }
  0x32   :  { %v500_v9 = vpop.eup %499  ;;  %v432_v29 = vpack.c.bf16 %v240_v23, %v239_v20  ;;  %v210_v31 = vmin.f32 %v194_v25, 1.0  ;;  %v329_v16 = vmul.f32 1.442695, %v369_v15  ;;  %v339_v25 = vld [vmem:[%s670_s3] sm:$0x1] }
  0x33   :  { %427 = vmatpush3.bf16.xpose.msra.mxu0 %v426_v56  ;;  %v502_v11 = vpop.eup %501  ;;  %v119_v19 = vadd.f32 1.0, %v500_v9  ;;  %v179_v27 = vadd.f32 -0.1, %v163_v21  ;;  %v241_v38 = vmul.f32 %v225_v34, %v209_v30  ;;  %v232_v9 = vld [vmem:[%s667_s1 + $0x78] sm:$0xff] }
  0x34   :  { %428 = vmatprep.subr.bf16.mxu0 %v517_v0  ;;  %v504_v17 = vpop.eup %503  ;;  %v120_v22 = vadd.f32 1.0, %v502_v11  ;;  %v242_v39 = vmul.f32 %v226_v35, %v210_v31 }
  0x35   :  { %v164_v26 = vmul.f32 1.2, %v504_v17  ;;  %509 = vrcp.f32 %v119_v19  ;;  %v195_v36 = vmax.f32 %v179_v27, 0.0 }
  0x36   :  { %511 = vrcp.f32 %v120_v22  ;;  %v435_v45 = vpack.c.bf16 %v242_v39, %v241_v38  ;;  %v342_v22 = vlaneseq }
  0x37   :  { %v506_v28 = vpop.eup %505  ;;  %v180_v32 = vadd.f32 -0.1, %v164_v26  ;;  %v211_v42 = vmin.f32 %v195_v36, 1.0  ;;  %513 = vpow2.f32 %v329_v16 }
  0x38   :  { %v508_v33 = vpop.eup %507  ;;  %v165_v37 = vmul.f32 1.2, %v506_v28  ;;  %v343_v24 = vshrl.u32 %v342_v22, 7 }
  0x39   :  { %v196_v40 = vmax.f32 %v180_v32, 0.0  ;;  %v166_v41 = vmul.f32 1.2, %v508_v33  ;;  %v243_v51 = vmul.f32 %v227_v47, %v211_v42 }
  0x3a   :  { %v181_v43 = vadd.f32 -0.1, %v165_v37  ;;  %v344_v27 = vsub.s32 0, %v343_v24 }
  0x3b   :  { %430 = vmatpush3.bf16.xpose.msra.mxu0 %v429_v12  ;;  %v212_v46 = vmin.f32 %v196_v40, 1.0  ;;  %v182_v48 = vadd.f32 -0.1, %v166_v41 }
  0x3c   :  { %431 = vmatprep.subr.bf16.mxu0 %v517_v0  ;;  %v197_v52 = vmax.f32 %v181_v43, 0.0 }
  0x3d   :  { %v244_v53 = vmul.f32 %v228_v50, %v212_v46  ;;  %v198_v54 = vmax.f32 %v182_v48, 0.0 }
  0x3e   :  { %v213_v57 = vmin.f32 %v197_v52, 1.0 }
  0x3f   :  { %v510_v44 = vpop.eup %509  ;;  %v438_v58 = vpack.c.bf16 %v244_v53, %v243_v51  ;;  %v214_v59 = vmin.f32 %v198_v54, 1.0 }
  0x40   :  { %v512_v49 = vpop.eup %511  ;;  %v167_v55 = vmul.f32 1.2, %v510_v44  ;;  %v245_v1 = vmul.f32 %v229_v62, %v213_v57 }
  0x41   :  { %v168_v56 = vmul.f32 1.2, %v512_v49  ;;  %v246_v2 = vmul.f32 %v230_v63, %v214_v59  ;;  %v514_v17 = vpop.eup %513 }
  0x42   :  { %v183_v60 = vadd.f32 -0.1, %v167_v55  ;;  %v331_v18 = vadd.f32 1.0, %v514_v17 }
  0x43   :  { %433 = vmatpush3.bf16.xpose.msra.mxu0 %v432_v29  ;;  %v184_v61 = vadd.f32 -0.1, %v168_v56  ;;  %v441_v5 = vpack.c.bf16 %v246_v2, %v245_v1 }
  0x44   :  { %434 = vmatprep.subr.bf16.mxu0 %v517_v0  ;;  %v199_v3 = vmax.f32 %v183_v60, 0.0  ;;  %515 = vrcp.f32 %v331_v18 }
  0x45   :  { %v200_v4 = vmax.f32 %v184_v61, 0.0 }
  0x46   :  { %v215_v6 = vmin.f32 %v199_v3, 1.0 }
  0x47   :  { %v216_v7 = vmin.f32 %v200_v4, 1.0 }
  0x48   :  { %v247_v10 = vmul.f32 %v231_v8, %v215_v6 }
  0x49   :  { %v248_v11 = vmul.f32 %v232_v9, %v216_v7 }
  0x4b   :  { %436 = vmatpush3.bf16.xpose.msra.mxu0 %v435_v45  ;;  %v444_v12 = vpack.c.bf16 %v248_v11, %v247_v10 }
  0x4c   :  { %437 = vmatprep.subr.bf16.mxu0 %v517_v0 }
  0x4e   :  { %v516_v19 = vpop.eup %515 }
  0x4f   :  { %v334_v20 = vmul.f32 1.2, %v516_v19 }
  0x53   :  { %439 = vmatpush3.bf16.xpose.msra.mxu0 %v438_v58 }
  0x54   :  { %440 = vmatprep.subr.bf16.mxu0 %v517_v0 }
  0x5b   :  { %442 = vmatpush3.bf16.xpose.msra.mxu0 %v441_v5 }
  0x5c   :  { %443 = vmatprep.subr.bf16.mxu0 %v517_v0  ;;  %v335_v0 = vadd.f32 -0.1, %v334_v20 }
  0x5e   :  { %v336_v21 = vmax.f32 %v335_v0, 0.0 }
  0x60   :  { %v337_v23 = vmin.f32 %v336_v21, 1.0 }
  0x62   :  { %v340_v26 = vmul.f32 %v339_v25, %v337_v23 }
  0x63   :  { %445 = vmatpush3.bf16.xpose.msra.mxu0 %v444_v12 }
  0x64   :  { %v345_v28 = vrot.slane %v340_v26, %v344_v27 }
  0x6a   :  { %420 = vmatmul.mubr.f32.vlgmr.msra.gmra.mrb[0].mxu0 %v250_v13 }
 0x13d   :  { %v317_v29 = vpop.f32.mrb[0].mxu0 }
 0x13e   :  { %v347_v30 = vadd.f32 %v345_v28, %v317_v29  ;;  %v421_v31 = vpop.f32.mrb[1].mxu0 }
 0x140   :  { %348 = vst [vmem:[%s671_s5] sm:$0xff] %v347_v30 }

</bundles_post_ra>
